<compile_context>
chip_gen: v7x
topology: tpu7x:2x2x1
jax: 0.10.0
libtpu: 0.0.40
codegen_flags: <defaults>
</compile_context>

<pallas_src>
import functools

import jax
import jax.numpy as jnp
from jax import lax
from jax.experimental import pallas as pl
from jax.experimental.pallas import tpu as pltpu


# ---------------------------------------------------------------------------
# Fused kernel: projections + L2 norm (per batch block), then loss (last step)
# ---------------------------------------------------------------------------
def _ase_fused_kernel(audio_ref, text_ref,
                      aw1_ref, ab1_ref, aw2_ref, ab2_ref,
                      tw1_ref, tb1_ref, tw2_ref, tb2_ref,
                      idx_col_ref, idx_row_ref, temp_ref,
                      loss_ref, a_scr, t_scr,
                      *, tile_b, b_true, e_true, embed_reg, compute_dtype):
    i = pl.program_id(0)

    def proj_norm(x_ref, w1_ref, b1_ref, w2_ref, b2_ref):
        # Linear -> ReLU -> Linear, then F.normalize(dim=-1).
        x = x_ref[...].astype(compute_dtype)
        h = jnp.dot(x, w1_ref[...].astype(compute_dtype),
                    preferred_element_type=jnp.float32) + b1_ref[...]
        h = jnp.maximum(h, 0.0)
        y = jnp.dot(h.astype(compute_dtype), w2_ref[...].astype(compute_dtype),
                    preferred_element_type=jnp.float32) + b2_ref[...]
        ss = jnp.sum(y * y, axis=-1, keepdims=True)
        return y * lax.rsqrt(jnp.maximum(ss, 1e-24))        # EUP rsqrt

    # Project this batch block for both modalities into the resident scratch.
    row0 = pl.multiple_of(i * tile_b, tile_b)
    a_scr[pl.ds(row0, tile_b), :] = proj_norm(audio_ref, aw1_ref, ab1_ref,
                                              aw2_ref, ab2_ref)
    t_scr[pl.ds(row0, tile_b), :] = proj_norm(text_ref, tw1_ref, tb1_ref,
                                              tw2_ref, tb2_ref)

    # Final grid step: similarity + symmetric soft-target cross-entropy.
    @pl.when(i == pl.num_programs(0) - 1)
    def _():
        bp = a_scr.shape[0]
        row_ids = lax.broadcasted_iota(jnp.int32, (bp, bp), 0)
        col_ids = lax.broadcasted_iota(jnp.int32, (bp, bp), 1)
        valid = (row_ids < b_true) & (col_ids < b_true)
        validf = valid.astype(jnp.float32)
        m_col = validf[:, 0:1]                  # [bp,1] 1.0 for real batch rows
        m_row = validf[0:1, :]                  # [1,bp]

        a = a_scr[...] * m_col                  # zero padded batch rows
        t = t_scr[...] * m_col

        # sim_a2t computed once; sim_t2a == sim_a2t.T, so the text->audio
        # cross-entropy is taken along axis 0 of the same matrix (no 2nd
        # matmul, no transpose).  1/temp is folded into the [B,E] operand.
        inv_temp = 1.0 / temp_ref[0, 0]
        a_scaled = a * inv_temp
        dims = (((1,), (1,)), ((), ()))         # contract the feature axes
        sim = lax.dot_general(a_scaled.astype(compute_dtype),
                              t.astype(compute_dtype),
                              dims, preferred_element_type=jnp.float32)
        simm = sim + (validf - 1.0) * 1e9       # push padded rows/cols to -inf

        # pos_idx = (idx == idx.T); sim_targets = pos_idx / pos_idx.sum(1)
        pos = ((idx_col_ref[...] == idx_row_ref[...]) & valid).astype(jnp.float32)
        targets = pos / jnp.maximum(jnp.sum(pos, axis=1, keepdims=True), 1.0)

        # log-sum-exp along both axes of the single similarity matrix.
        m1 = jnp.max(simm, axis=1, keepdims=True)
        lse1 = m1 + jnp.log(jnp.sum(jnp.exp(simm - m1), axis=1, keepdims=True))
        m0 = jnp.max(simm, axis=0, keepdims=True)
        lse0 = m0 + jnp.log(jnp.sum(jnp.exp(simm - m0), axis=0, keepdims=True))

        # targets is symmetric and its rows/cols sum to 1 on valid entries, so
        # CE_row_i = lse1_i - sum_j targets*sim ; CE_col_j = lse0_j - sum_i ...
        tp = targets * simm
        ce_a2t = lse1 - jnp.sum(tp, axis=1, keepdims=True)   # [bp,1]
        ce_t2a = lse0 - jnp.sum(tp, axis=0, keepdims=True)   # [1,bp]

        inv_b = 1.0 / float(b_true)
        loss = 0.5 * (jnp.sum(ce_a2t * m_col) + jnp.sum(ce_t2a * m_row)) * inv_b

        if embed_reg:
            inv_n = 1.0 / float(b_true * e_true)             # true-element mean
            loss = (loss
                    + jnp.sum(jnp.abs(a)) * inv_n * lax.rsqrt(jnp.sum(a * a))
                    + jnp.sum(jnp.abs(t)) * inv_n * lax.rsqrt(jnp.sum(t * t)))

        loss_ref[0, 0] = loss


# ---------------------------------------------------------------------------
# Wrapper: padding to lane-dense shapes + pallas_call
# ---------------------------------------------------------------------------
def _round_up(x, m):
    return (x + m - 1) // m * m


def _pad2(x, rows, cols):
    return jnp.pad(x, ((0, rows - x.shape[0]), (0, cols - x.shape[1])))


def ase_contrastive_loss(audio_feats, text_cls, params, idx, temp, *,
                         embed_reg=True, compute_dtype=jnp.float32):
    B, AW = audio_feats.shape
    TW = text_cls.shape[1]
    E = params["a_w2"].shape[1]

    # lane-dense padding: feature axes -> multiple of 128, batch -> multiple of 8
    AWp, TWp, Ep = _round_up(AW, 128), _round_up(TW, 128), _round_up(E, 128)
    Bp = _round_up(B, 8)
    tile_b = min(Bp, 128)
    while Bp % tile_b:
        tile_b -= 8
    nb = Bp // tile_b

    audio_p = _pad2(audio_feats.astype(jnp.float32), Bp, AWp)
    text_p = _pad2(text_cls.astype(jnp.float32), Bp, TWp)
    aw1 = _pad2(params["a_w1"], AWp, Ep)
    ab1 = _pad2(params["a_b1"].reshape(1, -1), 1, Ep)
    aw2 = _pad2(params["a_w2"], Ep, Ep)
    ab2 = _pad2(params["a_b2"].reshape(1, -1), 1, Ep)
    tw1 = _pad2(params["t_w1"], TWp, Ep)
    tb1 = _pad2(params["t_b1"].reshape(1, -1), 1, Ep)
    tw2 = _pad2(params["t_w2"], Ep, Ep)
    tb2 = _pad2(params["t_b2"].reshape(1, -1), 1, Ep)

    idx_i32 = idx.astype(jnp.int32)
    idx_col = _pad2(idx_i32.reshape(B, 1), Bp, 1)
    idx_row = _pad2(idx_i32.reshape(1, B), 1, Bp)
    temp_arr = jnp.asarray(temp, jnp.float32).reshape(1, 1)

    kernel = functools.partial(_ase_fused_kernel, tile_b=tile_b, b_true=B,
                               e_true=E, embed_reg=embed_reg,
                               compute_dtype=compute_dtype)

    def resident(shape):                       # VMEM-resident (never re-fetched)
        return pl.BlockSpec(shape, lambda i: (0, 0))

    grid_spec = pltpu.PrefetchScalarGridSpec(
        num_scalar_prefetch=0,
        grid=(nb,),
        in_specs=[
            pl.BlockSpec((tile_b, AWp), lambda i: (i, 0)),   # audio feats (blocked)
            pl.BlockSpec((tile_b, TWp), lambda i: (i, 0)),   # text CLS feats (blocked)
            resident((AWp, Ep)), resident((1, Ep)),          # audio proj layer 1
            resident((Ep, Ep)), resident((1, Ep)),           # audio proj layer 2
            resident((TWp, Ep)), resident((1, Ep)),          # text  proj layer 1
            resident((Ep, Ep)), resident((1, Ep)),           # text  proj layer 2
            resident((Bp, 1)),                               # idx column (int32)
            resident((1, Bp)),                               # idx row    (int32)
            pl.BlockSpec(memory_space=pltpu.MemorySpace.SMEM),   # temperature
        ],
        out_specs=pl.BlockSpec(memory_space=pltpu.MemorySpace.SMEM),
        scratch_shapes=[pltpu.VMEM((Bp, Ep), jnp.float32),   # audio embeds
                        pltpu.VMEM((Bp, Ep), jnp.float32)],  # text embeds
    )

    out = pl.pallas_call(
        kernel,
        out_shape=jax.ShapeDtypeStruct((1, 1), jnp.float32),
        grid_spec=grid_spec,
        compiler_params=pltpu.CompilerParams(
            dimension_semantics=("arbitrary",)),   # embeds accumulate across steps
    )(audio_p, text_p, aw1, ab1, aw2, ab2, tw1, tb1, tw2, tb2,
      idx_col, idx_row, temp_arr)
    return out[0, 0]


def ase_forward(params, audio_feats, text_feats, idx, temp, embed_reg=True,
                compute_dtype=jnp.float32):
    # CLS token sliced here: the lane axis must be zero-padded to 128 anyway,
    # and padding the tiny [B, text_width] slice is cheaper than padding /
    # DMA-ing the full [B, T, text_width] tensor through the kernel.
    text_cls = text_feats[:, 0, :]
    return ase_contrastive_loss(audio_feats, text_cls, params, idx, temp,
                                embed_reg=embed_reg, compute_dtype=compute_dtype)


def init_params(key, audio_width, text_width, embed_size):
    ks = jax.random.split(key, 8)
    s = 0.05
    return dict(
        a_w1=s * jax.random.normal(ks[0], (audio_width, embed_size), jnp.float32),
        a_b1=s * jax.random.normal(ks[1], (1, embed_size), jnp.float32),
        a_w2=s * jax.random.normal(ks[2], (embed_size, embed_size), jnp.float32),
        a_b2=s * jax.random.normal(ks[3], (1, embed_size), jnp.float32),
        t_w1=s * jax.random.normal(ks[4], (text_width, embed_size), jnp.float32),
        t_b1=s * jax.random.normal(ks[5], (1, embed_size), jnp.float32),
        t_w2=s * jax.random.normal(ks[6], (embed_size, embed_size), jnp.float32),
        t_b2=s * jax.random.normal(ks[7], (1, embed_size), jnp.float32),
    )


# ---------------------------------------------------------------------------
# Pure-JAX reference (mirrors the PyTorch forward) for a correctness check
# ---------------------------------------------------------------------------
def ase_reference(params, audio_feats, text_feats, idx, temp, embed_reg=True):
    def proj_norm(x, w1, b1, w2, b2):
        h = jnp.maximum(x @ w1 + b1, 0.0)
        y = h @ w2 + b2
        n = jnp.sqrt(jnp.sum(y * y, axis=-1, keepdims=True))
        return y / jnp.maximum(n, 1e-12)

    a = proj_norm(audio_feats, params["a_w1"], params["a_b1"],
                  params["a_w2"], params["a_b2"])
    t = proj_norm(text_feats[:, 0, :], params["t_w1"], params["t_b1"],
                  params["t_w2"], params["t_b2"])
    idx_c = idx.reshape(-1, 1)
    pos = (idx_c == idx_c.T).astype(jnp.float32)
    targets = pos / pos.sum(axis=1, keepdims=True)
    sim_a2t = a @ t.T / temp
    sim_t2a = t @ a.T / temp

    def xent(s):
        return jnp.mean(jnp.sum(-jax.nn.log_softmax(s, axis=1) * targets, axis=1))

    loss = 0.5 * (xent(sim_a2t) + xent(sim_t2a))
    if embed_reg:
        loss = (loss
                + jnp.mean(jnp.abs(a)) / jnp.sqrt(jnp.sum(a * a))
                + jnp.mean(jnp.abs(t)) / jnp.sqrt(jnp.sum(t * t)))
    return loss


if __name__ == "__main__":
    B, T = 8, 8
    audio_width, text_width, embed_size = 64, 48, 32
    temp = 0.07
    embed_reg = True

    key = jax.random.PRNGKey(0)
    k_af, k_tf, k_p = jax.random.split(key, 3)

    audio_feats = jax.random.normal(k_af, (B, audio_width), jnp.float32)
    text_feats = jax.random.normal(k_tf, (B, T, text_width), jnp.float32)
    idx = jnp.array([0, 1, 2, 3, 0, 1, 4, 5], dtype=jnp.int32)  # repeated ids

    params = init_params(k_p, audio_width, text_width, embed_size)

    loss = jax.block_until_ready(
        ase_forward(params, audio_feats, text_feats, idx, temp, embed_reg))
    assert jnp.isfinite(loss)

    with jax.default_matmul_precision("highest"):
        ref = jax.block_until_ready(
            ase_reference(params, audio_feats, text_feats, idx, temp, embed_reg))
    assert jnp.abs(loss - ref) < 5e-3, (float(loss), float(ref))

    print("KERNEL_OK")
</pallas_src>

<mosaic_0001>
module attributes {stable_mosaic.version = 11 : i64} {
  func.func @_ase_fused_kernel(%arg0: i32, %arg1: memref<8x128xf32, #tpu.memory_space<vmem>>, %arg2: memref<8x128xf32, #tpu.memory_space<vmem>>, %arg3: memref<128x128xf32, #tpu.memory_space<vmem>>, %arg4: memref<1x128xf32, #tpu.memory_space<vmem>>, %arg5: memref<128x128xf32, #tpu.memory_space<vmem>>, %arg6: memref<1x128xf32, #tpu.memory_space<vmem>>, %arg7: memref<128x128xf32, #tpu.memory_space<vmem>>, %arg8: memref<1x128xf32, #tpu.memory_space<vmem>>, %arg9: memref<128x128xf32, #tpu.memory_space<vmem>>, %arg10: memref<1x128xf32, #tpu.memory_space<vmem>>, %arg11: memref<8x1xi32, #tpu.memory_space<vmem>>, %arg12: memref<1x8xi32, #tpu.memory_space<vmem>>, %arg13: memref<1x1xf32, #tpu.memory_space<smem>>, %arg14: memref<1x1xf32, #tpu.memory_space<smem>>, %arg15: memref<8x128xf32, #tpu.memory_space<vmem>>, %arg16: memref<8x128xf32, #tpu.memory_space<vmem>>) attributes {dimension_semantics = [#tpu.dimension_semantics<arbitrary>], iteration_bounds = array<i64: 1>, scalar_prefetch = 0 : i64, scratch_operands = 2 : i64, tpu.core_type = #tpu.core_type<tc>, window_params = [{transform_indices = @transform_0, window_bounds = array<i64: 8, 128>}, {transform_indices = @transform_1, window_bounds = array<i64: 8, 128>}, {pipeline_mode = #tpu.pipeline_mode<synchronous>, transform_indices = @transform_2, window_bounds = array<i64: 128, 128>}, {pipeline_mode = #tpu.pipeline_mode<synchronous>, transform_indices = @transform_3, window_bounds = array<i64: 1, 128>}, {pipeline_mode = #tpu.pipeline_mode<synchronous>, transform_indices = @transform_4, window_bounds = array<i64: 128, 128>}, {pipeline_mode = #tpu.pipeline_mode<synchronous>, transform_indices = @transform_5, window_bounds = array<i64: 1, 128>}, {pipeline_mode = #tpu.pipeline_mode<synchronous>, transform_indices = @transform_6, window_bounds = array<i64: 128, 128>}, {pipeline_mode = #tpu.pipeline_mode<synchronous>, transform_indices = @transform_7, window_bounds = array<i64: 1, 128>}, {pipeline_mode = #tpu.pipeline_mode<synchronous>, transform_indices = @transform_8, window_bounds = array<i64: 128, 128>}, {pipeline_mode = #tpu.pipeline_mode<synchronous>, transform_indices = @transform_9, window_bounds = array<i64: 1, 128>}, {pipeline_mode = #tpu.pipeline_mode<synchronous>, transform_indices = @transform_10, window_bounds = array<i64: 8, 1>}, {pipeline_mode = #tpu.pipeline_mode<synchronous>, transform_indices = @transform_11, window_bounds = array<i64: 1, 8>}, {transform_indices = @transform_12, window_bounds = array<i64: 1, 1>}, {transform_indices = @transform_13, window_bounds = array<i64: 1, 1>}]} {
    %c8_i32 = arith.constant 8 : i32
    %0 = arith.muli %arg0, %c8_i32 : i32
    %1 = tpu.assume_multiple %0, 8 : i32
    %c0 = arith.constant 0 : index
    %c0_0 = arith.constant 0 : index
    %2 = vector.load %arg1[%c0, %c0_0] : memref<8x128xf32, #tpu.memory_space<vmem>>, vector<8x128xf32>
    %c0_1 = arith.constant 0 : index
    %c0_2 = arith.constant 0 : index
    %3 = vector.load %arg3[%c0_1, %c0_2] : memref<128x128xf32, #tpu.memory_space<vmem>>, vector<128x128xf32>
    %cst = arith.constant dense<0.000000e+00> : vector<8x128xf32>
    %4 = tpu.matmul %2, %3, %cst {dimension_numbers = #tpu.dot_dimension_numbers<[1], [0], [0], [1], [0, 0, 1, 1], [], []>} : vector<8x128xf32>, vector<128x128xf32>, vector<8x128xf32> -> vector<8x128xf32>
    %c0_3 = arith.constant 0 : index
    %c0_4 = arith.constant 0 : index
    %5 = vector.load %arg4[%c0_3, %c0_4] : memref<1x128xf32, #tpu.memory_space<vmem>>, vector<1x128xf32>
    %6 = vector.broadcast %5 : vector<1x128xf32> to vector<8x128xf32>
    %7 = arith.addf %4, %6 : vector<8x128xf32>
    %cst_5 = arith.constant 0.000000e+00 : f32
    %8 = vector.broadcast %cst_5 : f32 to vector<8x128xf32>
    %9 = arith.maximumf %7, %8 : vector<8x128xf32>
    %c0_6 = arith.constant 0 : index
    %c0_7 = arith.constant 0 : index
    %10 = vector.load %arg5[%c0_6, %c0_7] : memref<128x128xf32, #tpu.memory_space<vmem>>, vector<128x128xf32>
    %cst_8 = arith.constant dense<0.000000e+00> : vector<8x128xf32>
    %11 = tpu.matmul %9, %10, %cst_8 {dimension_numbers = #tpu.dot_dimension_numbers<[1], [0], [0], [1], [0, 0, 1, 1], [], []>} : vector<8x128xf32>, vector<128x128xf32>, vector<8x128xf32> -> vector<8x128xf32>
    %c0_9 = arith.constant 0 : index
    %c0_10 = arith.constant 0 : index
    %12 = vector.load %arg6[%c0_9, %c0_10] : memref<1x128xf32, #tpu.memory_space<vmem>>, vector<1x128xf32>
    %13 = vector.broadcast %12 : vector<1x128xf32> to vector<8x128xf32>
    %14 = arith.addf %11, %13 : vector<8x128xf32>
    %15 = arith.mulf %14, %14 : vector<8x128xf32>
    %cst_11 = arith.constant dense<0.000000e+00> : vector<8xf32>
    %16 = vector.multi_reduction <add>, %15, %cst_11 [1] : vector<8x128xf32> to vector<8xf32>
    %17 = vector.shape_cast %16 : vector<8xf32> to vector<8x1xf32>
    %cst_12 = arith.constant 1.000000e-24 : f32
    %18 = vector.broadcast %cst_12 : f32 to vector<8x1xf32>
    %19 = arith.maximumf %17, %18 : vector<8x1xf32>
    %20 = math.rsqrt %19 : vector<8x1xf32>
    %21 = vector.broadcast %20 : vector<8x1xf32> to vector<8x128xf32>
    %22 = arith.mulf %14, %21 : vector<8x128xf32>
    %23 = arith.index_cast %1 : i32 to index
    %c0_13 = arith.constant 0 : index
    %24 = vector.load %arg15[%23, %c0_13] : memref<8x128xf32, #tpu.memory_space<vmem>>, vector<8x128xf32>
    tpu.vector_store %arg15[%23, %c0_13], %22 {strides = array<i32>} : memref<8x128xf32, #tpu.memory_space<vmem>>, vector<8x128xf32>,
    %c0_14 = arith.constant 0 : index
    %c0_15 = arith.constant 0 : index
    %25 = vector.load %arg2[%c0_14, %c0_15] : memref<8x128xf32, #tpu.memory_space<vmem>>, vector<8x128xf32>
    %c0_16 = arith.constant 0 : index
    %c0_17 = arith.constant 0 : index
    %26 = vector.load %arg7[%c0_16, %c0_17] : memref<128x128xf32, #tpu.memory_space<vmem>>, vector<128x128xf32>
    %cst_18 = arith.constant dense<0.000000e+00> : vector<8x128xf32>
    %27 = tpu.matmul %25, %26, %cst_18 {dimension_numbers = #tpu.dot_dimension_numbers<[1], [0], [0], [1], [0, 0, 1, 1], [], []>} : vector<8x128xf32>, vector<128x128xf32>, vector<8x128xf32> -> vector<8x128xf32>
    %c0_19 = arith.constant 0 : index
    %c0_20 = arith.constant 0 : index
    %28 = vector.load %arg8[%c0_19, %c0_20] : memref<1x128xf32, #tpu.memory_space<vmem>>, vector<1x128xf32>
    %29 = vector.broadcast %28 : vector<1x128xf32> to vector<8x128xf32>
    %30 = arith.addf %27, %29 : vector<8x128xf32>
    %cst_21 = arith.constant 0.000000e+00 : f32
    %31 = vector.broadcast %cst_21 : f32 to vector<8x128xf32>
    %32 = arith.maximumf %30, %31 : vector<8x128xf32>
    %c0_22 = arith.constant 0 : index
    %c0_23 = arith.constant 0 : index
    %33 = vector.load %arg9[%c0_22, %c0_23] : memref<128x128xf32, #tpu.memory_space<vmem>>, vector<128x128xf32>
    %cst_24 = arith.constant dense<0.000000e+00> : vector<8x128xf32>
    %34 = tpu.matmul %32, %33, %cst_24 {dimension_numbers = #tpu.dot_dimension_numbers<[1], [0], [0], [1], [0, 0, 1, 1], [], []>} : vector<8x128xf32>, vector<128x128xf32>, vector<8x128xf32> -> vector<8x128xf32>
    %c0_25 = arith.constant 0 : index
    %c0_26 = arith.constant 0 : index
    %35 = vector.load %arg10[%c0_25, %c0_26] : memref<1x128xf32, #tpu.memory_space<vmem>>, vector<1x128xf32>
    %36 = vector.broadcast %35 : vector<1x128xf32> to vector<8x128xf32>
    %37 = arith.addf %34, %36 : vector<8x128xf32>
    %38 = arith.mulf %37, %37 : vector<8x128xf32>
    %cst_27 = arith.constant dense<0.000000e+00> : vector<8xf32>
    %39 = vector.multi_reduction <add>, %38, %cst_27 [1] : vector<8x128xf32> to vector<8xf32>
    %40 = vector.shape_cast %39 : vector<8xf32> to vector<8x1xf32>
    %cst_28 = arith.constant 1.000000e-24 : f32
    %41 = vector.broadcast %cst_28 : f32 to vector<8x1xf32>
    %42 = arith.maximumf %40, %41 : vector<8x1xf32>
    %43 = math.rsqrt %42 : vector<8x1xf32>
    %44 = vector.broadcast %43 : vector<8x1xf32> to vector<8x128xf32>
    %45 = arith.mulf %37, %44 : vector<8x128xf32>
    %46 = arith.index_cast %1 : i32 to index
    %c0_29 = arith.constant 0 : index
    %47 = vector.load %arg16[%46, %c0_29] : memref<8x128xf32, #tpu.memory_space<vmem>>, vector<8x128xf32>
    tpu.vector_store %arg16[%46, %c0_29], %45 {strides = array<i32>} : memref<8x128xf32, #tpu.memory_space<vmem>>, vector<8x128xf32>,
    %c0_i32 = arith.constant 0 : i32
    %48 = arith.cmpi eq, %arg0, %c0_i32 : i32
    %49 = arith.extui %48 : i1 to i32
    %c0_i32_30 = arith.constant 0 : i32
    %50 = arith.cmpi ne, %49, %c0_i32_30 : i32
    scf.if %50 {
      %51 = tpu.iota {dimensions = array<i32: 0>} : vector<8x8xi32>
      %52 = tpu.iota {dimensions = array<i32: 1>} : vector<8x8xi32>
      %c8_i32_31 = arith.constant 8 : i32
      %53 = vector.broadcast %c8_i32_31 : i32 to vector<8x8xi32>
      %54 = arith.cmpi slt, %51, %53 : vector<8x8xi32>
      %c8_i32_32 = arith.constant 8 : i32
      %55 = vector.broadcast %c8_i32_32 : i32 to vector<8x8xi32>
      %56 = arith.cmpi slt, %52, %55 : vector<8x8xi32>
      %57 = arith.andi %54, %56 : vector<8x8xi1>
      %58 = arith.extui %57 : vector<8x8xi1> to vector<8x8xi32>
      %59 = arith.sitofp %58 : vector<8x8xi32> to vector<8x8xf32>
      %60 = vector.extract_strided_slice %59 {offsets = [0, 0], sizes = [8, 1], strides = [1, 1]} : vector<8x8xf32> to vector<8x1xf32>
      %61 = vector.extract_strided_slice %59 {offsets = [0, 0], sizes = [1, 8], strides = [1, 1]} : vector<8x8xf32> to vector<1x8xf32>
      %c0_33 = arith.constant 0 : index
      %c0_34 = arith.constant 0 : index
      %62 = vector.load %arg15[%c0_33, %c0_34] : memref<8x128xf32, #tpu.memory_space<vmem>>, vector<8x128xf32>
      %63 = vector.broadcast %60 : vector<8x1xf32> to vector<8x128xf32>
      %64 = arith.mulf %62, %63 : vector<8x128xf32>
      %c0_35 = arith.constant 0 : index
      %c0_36 = arith.constant 0 : index
      %65 = vector.load %arg16[%c0_35, %c0_36] : memref<8x128xf32, #tpu.memory_space<vmem>>, vector<8x128xf32>
      %66 = vector.broadcast %60 : vector<8x1xf32> to vector<8x128xf32>
      %67 = arith.mulf %65, %66 : vector<8x128xf32>
      %c0_37 = arith.constant 0 : index
      %c0_38 = arith.constant 0 : index
      %68 = memref.load %arg13[%c0_37, %c0_38] : memref<1x1xf32, #tpu.memory_space<smem>>
      %cst_39 = arith.constant 1.000000e+00 : f32
      %69 = arith.divf %cst_39, %68 : f32
      %70 = vector.broadcast %69 : f32 to vector<8x128xf32>
      %71 = arith.mulf %64, %70 : vector<8x128xf32>
      %cst_40 = arith.constant dense<0.000000e+00> : vector<8x8xf32>
      %72 = tpu.matmul %71, %67, %cst_40 {dimension_numbers = #tpu.dot_dimension_numbers<[1], [1], [0], [0], [0, 0, 1, 0], [], []>} : vector<8x128xf32>, vector<8x128xf32>, vector<8x8xf32> -> vector<8x8xf32>
      %cst_41 = arith.constant 1.000000e+00 : f32
      %73 = vector.broadcast %cst_41 : f32 to vector<8x8xf32>
      %74 = arith.subf %59, %73 : vector<8x8xf32>
      %cst_42 = arith.constant 1.000000e+09 : f32
      %75 = vector.broadcast %cst_42 : f32 to vector<8x8xf32>
      %76 = arith.mulf %74, %75 : vector<8x8xf32>
      %77 = arith.addf %72, %76 : vector<8x8xf32>
      %c0_43 = arith.constant 0 : index
      %c0_44 = arith.constant 0 : index
      %78 = vector.load %arg11[%c0_43, %c0_44] : memref<8x1xi32, #tpu.memory_space<vmem>>, vector<8x1xi32>
      %c0_45 = arith.constant 0 : index
      %c0_46 = arith.constant 0 : index
      %79 = vector.load %arg12[%c0_45, %c0_46] : memref<1x8xi32, #tpu.memory_space<vmem>>, vector<1x8xi32>
      %80 = vector.broadcast %78 : vector<8x1xi32> to vector<8x8xi32>
      %81 = vector.broadcast %79 : vector<1x8xi32> to vector<8x8xi32>
      %82 = arith.cmpi eq, %80, %81 : vector<8x8xi32>
      %83 = arith.andi %82, %57 : vector<8x8xi1>
      %84 = arith.extui %83 : vector<8x8xi1> to vector<8x8xi32>
      %85 = arith.sitofp %84 : vector<8x8xi32> to vector<8x8xf32>
      %cst_47 = arith.constant dense<0.000000e+00> : vector<8xf32>
      %86 = vector.multi_reduction <add>, %85, %cst_47 [1] : vector<8x8xf32> to vector<8xf32>
      %87 = vector.shape_cast %86 : vector<8xf32> to vector<8x1xf32>
      %cst_48 = arith.constant 1.000000e+00 : f32
      %88 = vector.broadcast %cst_48 : f32 to vector<8x1xf32>
      %89 = arith.maximumf %87, %88 : vector<8x1xf32>
      %90 = vector.broadcast %89 : vector<8x1xf32> to vector<8x8xf32>
      %91 = arith.divf %85, %90 : vector<8x8xf32>
      %cst_49 = arith.constant dense<0xFF800000> : vector<8xf32>
      %92 = vector.multi_reduction <maximumf>, %77, %cst_49 [1] : vector<8x8xf32> to vector<8xf32>
      %93 = vector.shape_cast %92 : vector<8xf32> to vector<8x1xf32>
      %94 = vector.broadcast %93 : vector<8x1xf32> to vector<8x8xf32>
      %95 = arith.subf %77, %94 : vector<8x8xf32>
      %96 = math.exp %95 : vector<8x8xf32>
      %cst_50 = arith.constant dense<0.000000e+00> : vector<8xf32>
      %97 = vector.multi_reduction <add>, %96, %cst_50 [1] : vector<8x8xf32> to vector<8xf32>
      %98 = vector.shape_cast %97 : vector<8xf32> to vector<8x1xf32>
      %99 = math.log %98 : vector<8x1xf32>
      %100 = arith.addf %93, %99 : vector<8x1xf32>
      %cst_51 = arith.constant dense<0xFF800000> : vector<8xf32>
      %101 = vector.multi_reduction <maximumf>, %77, %cst_51 [0] : vector<8x8xf32> to vector<8xf32>
      %102 = vector.shape_cast %101 : vector<8xf32> to vector<1x8xf32>
      %103 = vector.broadcast %102 : vector<1x8xf32> to vector<8x8xf32>
      %104 = arith.subf %77, %103 : vector<8x8xf32>
      %105 = math.exp %104 : vector<8x8xf32>
      %cst_52 = arith.constant dense<0.000000e+00> : vector<8xf32>
      %106 = vector.multi_reduction <add>, %105, %cst_52 [0] : vector<8x8xf32> to vector<8xf32>
      %107 = vector.shape_cast %106 : vector<8xf32> to vector<1x8xf32>
      %108 = math.log %107 : vector<1x8xf32>
      %109 = arith.addf %102, %108 : vector<1x8xf32>
      %110 = arith.mulf %91, %77 : vector<8x8xf32>
      %cst_53 = arith.constant dense<0.000000e+00> : vector<8xf32>
      %111 = vector.multi_reduction <add>, %110, %cst_53 [1] : vector<8x8xf32> to vector<8xf32>
      %112 = vector.shape_cast %111 : vector<8xf32> to vector<8x1xf32>
      %113 = arith.subf %100, %112 : vector<8x1xf32>
      %cst_54 = arith.constant dense<0.000000e+00> : vector<8xf32>
      %114 = vector.multi_reduction <add>, %110, %cst_54 [0] : vector<8x8xf32> to vector<8xf32>
      %115 = vector.shape_cast %114 : vector<8xf32> to vector<1x8xf32>
      %116 = arith.subf %109, %115 : vector<1x8xf32>
      %117 = arith.mulf %113, %60 : vector<8x1xf32>
      %118 = vector.shape_cast %117 : vector<8x1xf32> to vector<1x8x1xf32>
      %cst_55 = arith.constant dense<0.000000e+00> : vector<1xf32>
      %119 = vector.multi_reduction <add>, %118, %cst_55 [1, 2] : vector<1x8x1xf32> to vector<1xf32>
      %120 = vector.shape_cast %119 : vector<1xf32> to vector<1x1x1xf32>
      %121 = vector.extract %120[0, 0, 0] : f32 from vector<1x1x1xf32>
      %122 = arith.mulf %116, %61 : vector<1x8xf32>
      %123 = vector.shape_cast %122 : vector<1x8xf32> to vector<1x1x8xf32>
      %cst_56 = arith.constant dense<0.000000e+00> : vector<1xf32>
      %124 = vector.multi_reduction <add>, %123, %cst_56 [1, 2] : vector<1x1x8xf32> to vector<1xf32>
      %125 = vector.shape_cast %124 : vector<1xf32> to vector<1x1x1xf32>
      %126 = vector.extract %125[0, 0, 0] : f32 from vector<1x1x1xf32>
      %127 = arith.addf %121, %126 : f32
      %cst_57 = arith.constant 5.000000e-01 : f32
      %128 = arith.mulf %cst_57, %127 : f32
      %cst_58 = arith.constant 1.250000e-01 : f32
      %129 = arith.mulf %128, %cst_58 : f32
      %130 = math.absf %64 : vector<8x128xf32>
      %131 = vector.shape_cast %130 : vector<8x128xf32> to vector<1x8x128xf32>
      %cst_59 = arith.constant dense<0.000000e+00> : vector<1xf32>
      %132 = vector.multi_reduction <add>, %131, %cst_59 [1, 2] : vector<1x8x128xf32> to vector<1xf32>
      %133 = vector.shape_cast %132 : vector<1xf32> to vector<1x1x1xf32>
      %134 = vector.extract %133[0, 0, 0] : f32 from vector<1x1x1xf32>
      %cst_60 = arith.constant 3.906250e-03 : f32
      %135 = arith.mulf %134, %cst_60 : f32
      %136 = arith.mulf %64, %64 : vector<8x128xf32>
      %137 = vector.shape_cast %136 : vector<8x128xf32> to vector<1x8x128xf32>
      %cst_61 = arith.constant dense<0.000000e+00> : vector<1xf32>
      %138 = vector.multi_reduction <add>, %137, %cst_61 [1, 2] : vector<1x8x128xf32> to vector<1xf32>
      %139 = vector.shape_cast %138 : vector<1xf32> to vector<1x1x1xf32>
      %140 = vector.extract %139[0, 0, 0] : f32 from vector<1x1x1xf32>
      %141 = math.rsqrt %140 : f32
      %142 = arith.mulf %135, %141 : f32
      %143 = arith.addf %129, %142 : f32
      %144 = math.absf %67 : vector<8x128xf32>
      %145 = vector.shape_cast %144 : vector<8x128xf32> to vector<1x8x128xf32>
      %cst_62 = arith.constant dense<0.000000e+00> : vector<1xf32>
      %146 = vector.multi_reduction <add>, %145, %cst_62 [1, 2] : vector<1x8x128xf32> to vector<1xf32>
      %147 = vector.shape_cast %146 : vector<1xf32> to vector<1x1x1xf32>
      %148 = vector.extract %147[0, 0, 0] : f32 from vector<1x1x1xf32>
      %cst_63 = arith.constant 3.906250e-03 : f32
      %149 = arith.mulf %148, %cst_63 : f32
      %150 = arith.mulf %67, %67 : vector<8x128xf32>
      %151 = vector.shape_cast %150 : vector<8x128xf32> to vector<1x8x128xf32>
      %cst_64 = arith.constant dense<0.000000e+00> : vector<1xf32>
      %152 = vector.multi_reduction <add>, %151, %cst_64 [1, 2] : vector<1x8x128xf32> to vector<1xf32>
      %153 = vector.shape_cast %152 : vector<1xf32> to vector<1x1x1xf32>
      %154 = vector.extract %153[0, 0, 0] : f32 from vector<1x1x1xf32>
      %155 = math.rsqrt %154 : f32
      %156 = arith.mulf %149, %155 : f32
      %157 = arith.addf %143, %156 : f32
      %c0_65 = arith.constant 0 : index
      %c0_66 = arith.constant 0 : index
      %158 = memref.load %arg14[%c0_65, %c0_66] : memref<1x1xf32, #tpu.memory_space<smem>>
      memref.store %157, %arg14[%c0_65, %c0_66] : memref<1x1xf32, #tpu.memory_space<smem>>
    } else {
    }
    return
  }
  func.func @transform_0(%arg0: i32) -> (i32, i32) {
    %c0_i32 = arith.constant 0 : i32
    %c0_i32_0 = arith.constant 0 : i32
    return %arg0, %c0_i32 : i32, i32
  }
  func.func @transform_1(%arg0: i32) -> (i32, i32) {
    %c0_i32 = arith.constant 0 : i32
    %c0_i32_0 = arith.constant 0 : i32
    return %arg0, %c0_i32 : i32, i32
  }
  func.func @transform_2(%arg0: i32) -> (i32, i32) {
    %c0_i32 = arith.constant 0 : i32
    %c0_i32_0 = arith.constant 0 : i32
    %c0_i32_1 = arith.constant 0 : i32
    return %c0_i32, %c0_i32_0 : i32, i32
  }
  func.func @transform_3(%arg0: i32) -> (i32, i32) {
    %c0_i32 = arith.constant 0 : i32
    %c0_i32_0 = arith.constant 0 : i32
    %c0_i32_1 = arith.constant 0 : i32
    return %c0_i32, %c0_i32_0 : i32, i32
  }
  func.func @transform_4(%arg0: i32) -> (i32, i32) {
    %c0_i32 = arith.constant 0 : i32
    %c0_i32_0 = arith.constant 0 : i32
    %c0_i32_1 = arith.constant 0 : i32
    return %c0_i32, %c0_i32_0 : i32, i32
  }
  func.func @transform_5(%arg0: i32) -> (i32, i32) {
    %c0_i32 = arith.constant 0 : i32
    %c0_i32_0 = arith.constant 0 : i32
    %c0_i32_1 = arith.constant 0 : i32
    return %c0_i32, %c0_i32_0 : i32, i32
  }
  func.func @transform_6(%arg0: i32) -> (i32, i32) {
    %c0_i32 = arith.constant 0 : i32
    %c0_i32_0 = arith.constant 0 : i32
    %c0_i32_1 = arith.constant 0 : i32
    return %c0_i32, %c0_i32_0 : i32, i32
  }
  func.func @transform_7(%arg0: i32) -> (i32, i32) {
    %c0_i32 = arith.constant 0 : i32
    %c0_i32_0 = arith.constant 0 : i32
    %c0_i32_1 = arith.constant 0 : i32
    return %c0_i32, %c0_i32_0 : i32, i32
  }
  func.func @transform_8(%arg0: i32) -> (i32, i32) {
    %c0_i32 = arith.constant 0 : i32
    %c0_i32_0 = arith.constant 0 : i32
    %c0_i32_1 = arith.constant 0 : i32
    return %c0_i32, %c0_i32_0 : i32, i32
  }
  func.func @transform_9(%arg0: i32) -> (i32, i32) {
    %c0_i32 = arith.constant 0 : i32
    %c0_i32_0 = arith.constant 0 : i32
    %c0_i32_1 = arith.constant 0 : i32
    return %c0_i32, %c0_i32_0 : i32, i32
  }
  func.func @transform_10(%arg0: i32) -> (i32, i32) {
    %c0_i32 = arith.constant 0 : i32
    %c0_i32_0 = arith.constant 0 : i32
    %c0_i32_1 = arith.constant 0 : i32
    return %c0_i32, %c0_i32_0 : i32, i32
  }
  func.func @transform_11(%arg0: i32) -> (i32, i32) {
    %c0_i32 = arith.constant 0 : i32
    %c0_i32_0 = arith.constant 0 : i32
    %c0_i32_1 = arith.constant 0 : i32
    return %c0_i32, %c0_i32_0 : i32, i32
  }
  func.func @transform_12(%arg0: i32) -> (i32, i32) {
    %c0_i32 = arith.constant 0 : i32
    %c0_i32_0 = arith.constant 0 : i32
    %c0_i32_1 = arith.constant 0 : i32
    return %c0_i32, %c0_i32_0 : i32, i32
  }
  func.func @transform_13(%arg0: i32) -> (i32, i32) {
    %c0_i32 = arith.constant 0 : i32
    %c0_i32_0 = arith.constant 0 : i32
    %c0_i32_1 = arith.constant 0 : i32
    return %c0_i32, %c0_i32_0 : i32, i32
  }
}

</mosaic_0001>

<bundles_post_ra>
// kernel: tpu_custom_call.1
= control target key start
LH: loop header
LB: loop body
LE: loop exit
PB: predicated region body
PF: predicated region fallthrough
CT: control target
= control target key end

     0   :  { %19 = vsyncpa [#allocation6], 0  ;;  %s1498_s0 = inlined_call_operand.vmem [shape: f32[8,128], index: 0, kind: input, shape index: {}]   ;;  %s1499_s1 = inlined_call_operand.vmem [shape: f32[8,128], index: 1, kind: input, shape index: {}]   ;;  %s1500_s2 = inlined_call_operand.hbm [shape: f32[128,128], index: 2, kind: input, shape index: {}]   ;;  %s1501_s3 = inlined_call_operand.vmem [shape: f32[1,128], index: 3, kind: input, shape index: {}]   ;;  %s1502_s4 = inlined_call_operand.hbm [shape: f32[128,128], index: 4, kind: input, shape index: {}]   ;;  %s1503_s5 = inlined_call_operand.vmem [shape: f32[1,128], index: 5, kind: input, shape index: {}]   ;;  %s1504_s6 = inlined_call_operand.hbm [shape: f32[128,128], index: 6, kind: input, shape index: {}]   ;;  %s1505_s7 = inlined_call_operand.vmem [shape: f32[1,128], index: 7, kind: input, shape index: {}]   ;;  %s1506_s8 = inlined_call_operand.hbm [shape: f32[128,128], index: 8, kind: input, shape index: {}]   ;;  %s1507_s9 = inlined_call_operand.vmem [shape: f32[1,128], index: 9, kind: input, shape index: {}]   ;;  %s1508_s10 = inlined_call_operand.vmem [shape: s32[8,1], index: 10, kind: input, shape index: {}]   ;;  %s1509_s11 = inlined_call_operand.vmem [shape: s32[1,8], index: 11, kind: input, shape index: {}]   ;;  %s1510_s12 = inlined_call_operand.<no memory space> [shape: f32[1,1], index: 12, kind: input, shape index: {}]   ;;  %s1511_s13 = inlined_call_operand.hbm [shape: f32[1,1], index: 13, kind: output, shape index: {}]  }
   0x1   :  { %20 = vsyncpa [#allocation9], 0 }
   0x2   :  { %21 = vsyncpa [#allocation12], 0 }
   0x3   :  { %22 = vsyncpa [#allocation7], 0  ;;  %s1230_s25 = smov [#allocation8]   ;;  %s1231_s27 = smov [#allocation5]  }
   0x4   :  { %s46_s26 = sshll.u32 %s1230_s25, 4  ;;  %s32_s28 = sshll.u32 %s1231_s27, 4  ;;  %s47_s26 = int_to_ptr.vmem [resolvable:$true] %s46_s26  ;;  %s1311_s28 = int_to_ptr.vmem [resolvable:$true] %s32_s28 }
   0x5   :  { %s1124_s14 = scalar_lea.hbm %s1502_s4, 2048 }
   0x6   :  { %p1125_p0 = scmp.ne.s32.totalorder %s1502_s4, %s1124_s14  ;;  %p1128_p1 = scmp.lt.u32.totalorder %s1124_s14, %s1502_s4 }
   0x8   :  { %p1130_p2 = pnand %p1128_p1, %p1125_p0 }
   0xa   :  { %1133 = shalt.err (!%p1130_p2)
}
   0xb   :  { %s1134_s19 = scalar_lea.vmem %s47_s26, 2048  ;;  %p1139_p4 = scmp.lt.s32.totalorder %s47_s26, %s47_s26 }
   0xc   :  { %p1135_p3 = scmp.ne.s32.totalorder %s47_s26, %s1134_s19  ;;  %p1140_p5 = scmp.lt.s32.totalorder %s1134_s19, %s1134_s19 }
   0xe   :  { %p1141_p6 = por %p1140_p5, %p1139_p4 }
  0x10   :  { %p1142_p7 = pnand %p1141_p6, %p1135_p3 }
  0x12   :  { %1145 = shalt.err (!%p1142_p7)
}
  0x13   :  { %s1232_s20 = smov 128   ;;  %s1233_s21 = smov 8  }
  0x14   :  { %52 = dma.hbm_to_vmem [thread:$0]  %s1502_s4, 2048, %s47_s26, [#allocation9], %s1232_s20, %s1232_s20, %s1233_s21  }
  0x15   :  { %s1146_s27 = scalar_lea.hbm %s1500_s2, 2048 }
  0x16   :  { %p1147_p8 = scmp.ne.s32.totalorder %s1500_s2, %s1146_s27  ;;  %p1150_p9 = scmp.lt.u32.totalorder %s1146_s27, %s1500_s2 }
  0x18   :  { %p1152_p10 = pnand %p1150_p9, %p1147_p8 }
  0x1a   :  { %1155 = shalt.err (!%p1152_p10)
}
  0x1b   :  { %s1156_s16 = scalar_lea.vmem %s1311_s28, 2048  ;;  %p1161_p12 = scmp.lt.s32.totalorder %s1311_s28, %s1311_s28 }
  0x1c   :  { %p1157_p11 = scmp.ne.s32.totalorder %s1311_s28, %s1156_s16  ;;  %p1162_p13 = scmp.lt.s32.totalorder %s1156_s16, %s1156_s16 }
  0x1e   :  { %p1163_p0 = por %p1162_p13, %p1161_p12 }
  0x20   :  { %p1164_p1 = pnand %p1163_p0, %p1157_p11 }
  0x22   :  { %1167 = shalt.err (!%p1164_p1)
}
  0x23   :  { %38 = dma.hbm_to_vmem [thread:$0]  %s1500_s2, 2048, %s1311_s28, [#allocation6], %s1232_s20, %s1232_s20, %s1233_s21  }
  0x24   :  { %s1234_s17 = smov [#allocation10]   ;;  %s1235_s19 = smov [#allocation11]  }
  0x25   :  { %s60_s18 = sshll.u32 %s1234_s17, 4  ;;  %s74_s22 = sshll.u32 %s1235_s19, 4  ;;  %s61_s18 = int_to_ptr.vmem [resolvable:$true] %s60_s18  ;;  %s1348_s22 = int_to_ptr.vmem [resolvable:$true] %s74_s22 }
  0x26   :  { %s1168_s25 = scalar_lea.hbm %s1504_s6, 2048 }
  0x27   :  { %p1169_p2 = scmp.ne.s32.totalorder %s1504_s6, %s1168_s25  ;;  %p1172_p3 = scmp.lt.u32.totalorder %s1168_s25, %s1504_s6 }
  0x29   :  { %p1174_p4 = pnand %p1172_p3, %p1169_p2 }
  0x2b   :  { %1177 = shalt.err (!%p1174_p4)
}
  0x2c   :  { %s1178_s2 = scalar_lea.vmem %s61_s18, 2048  ;;  %p1183_p6 = scmp.lt.s32.totalorder %s61_s18, %s61_s18 }
  0x2d   :  { %p1179_p5 = scmp.ne.s32.totalorder %s61_s18, %s1178_s2  ;;  %p1184_p7 = scmp.lt.s32.totalorder %s1178_s2, %s1178_s2 }
  0x2f   :  { %p1185_p8 = por %p1184_p7, %p1183_p6 }
  0x31   :  { %p1186_p9 = pnand %p1185_p8, %p1179_p5 }
  0x33   :  { %1189 = shalt.err (!%p1186_p9)
}
  0x34   :  { %66 = dma.hbm_to_vmem [thread:$0]  %s1504_s6, 2048, %s61_s18, [#allocation9], %s1232_s20, %s1232_s20, %s1233_s21  }
  0x35   :  { %s1190_s26 = scalar_lea.hbm %s1506_s8, 2048 }
  0x36   :  { %p1191_p10 = scmp.ne.s32.totalorder %s1506_s8, %s1190_s26  ;;  %p1194_p11 = scmp.lt.u32.totalorder %s1190_s26, %s1506_s8 }
  0x38   :  { %p1196_p12 = pnand %p1194_p11, %p1191_p10 }
  0x3a   :  { %1199 = shalt.err (!%p1196_p12)
}
  0x3b   :  { %s1200_s25 = scalar_lea.vmem %s1348_s22, 2048  ;;  %p1205_p0 = scmp.lt.s32.totalorder %s1348_s22, %s1348_s22 }
  0x3c   :  { %p1201_p13 = scmp.ne.s32.totalorder %s1348_s22, %s1200_s25  ;;  %p1206_p1 = scmp.lt.s32.totalorder %s1200_s25, %s1200_s25 }
  0x3e   :  { %p1207_p2 = por %p1206_p1, %p1205_p0 }
  0x40   :  { %p1208_p3 = pnand %p1207_p2, %p1201_p13 }
  0x42   :  { %1211 = shalt.err (!%p1208_p3)
}
  0x43   :  { %80 = dma.hbm_to_vmem [thread:$0]  %s1506_s8, 2048, %s1348_s22, [#allocation12], %s1232_s20, %s1232_s20, %s1233_s21  }
  0x44   :  { %1222 = dma.done.wait [#allocation6], 2048  }
  0x45   :  { %1223 = vsyncadd [#allocation6], 4294965248 }
  0x46   :  { %1224 = dma.done.wait [#allocation9], 4096  }
  0x47   :  { %1225 = vsyncadd [#allocation9], 4294963200 }
  0x48   :  { %1226 = dma.done.wait [#allocation12], 2048  }
  0x49   :  { %1227 = vsyncadd [#allocation12], 4294965248  ;;  %v1236_v0 = vmov 0.0|0.0   ;;  %vm1237_vm0 = vmmov 0   ;;  %v1238_v1 = vmov 0.0   ;;  %v103_v2 = vld [vmem:[#allocation5] sm:$0xff] }
  0x4a   :  { %977 = vmatprep.subr.bf16.mxu0 %v1236_v0  ;;  %864 = vmatprep.mubr.msk.f32.mxu0 %vm1237_vm0, %v1238_v1  ;;  %v104_v3 = vld [vmem:[#allocation5 + $0x8] sm:$0xff]  ;;  %v105_v4 = vld [vmem:[#allocation5 + $0x10] sm:$0xff]  ;;  %v106_v6 = vld [vmem:[#allocation5 + $0x18] sm:$0xff]  ;;  %vm607_vm4 = vcmask 64512   ;;  %vm670_vm5 = vcmask 57344   ;;  %vm658_vm6 = vcmask 7168  }
  0x4b   :  { %1001 = vmatprep.subr.bf16.mxu1 %v1236_v0  ;;  %899 = vmatprep.mubr.msk.f32.mxu1 %vm1237_vm0, %v1238_v1  ;;  %v978_v5 = vpack.c.bf16 %v104_v3, %v103_v2  ;;  %v981_v7 = vpack.c.bf16 %v106_v6, %v105_v4  ;;  %v107_v8 = vld [vmem:[#allocation5 + $0x20] sm:$0xff]  ;;  %v108_v9 = vld [vmem:[#allocation5 + $0x28] sm:$0xff]  ;;  %v109_v11 = vld [vmem:[#allocation5 + $0x30] sm:$0xff] }
  0x4c   :  { %v984_v10 = vpack.c.bf16 %v108_v9, %v107_v8  ;;  %v110_v12 = vld [vmem:[#allocation5 + $0x38] sm:$0xff]  ;;  %v111_v14 = vld [vmem:[#allocation5 + $0x40] sm:$0xff]  ;;  %v198_v16 = vld [vmem:[#allocation8 + $0x8] sm:$0xff] }
  0x4d   :  { %979 = vmatpush3.bf16.msra.mxu0 %v978_v5  ;;  %v987_v13 = vpack.c.bf16 %v110_v12, %v109_v11  ;;  %v197_v15 = vld [vmem:[#allocation8] sm:$0xff]  ;;  %v112_v17 = vld [vmem:[#allocation5 + $0x48] sm:$0xff]  ;;  %v199_v19 = vld [vmem:[#allocation8 + $0x10] sm:$0xff] }
  0x4e   :  { %980 = vmatprep.subr.bf16.mxu0 %v1236_v0  ;;  %v1002_v18 = vpack.c.bf16 %v198_v16, %v197_v15  ;;  %v200_v20 = vld [vmem:[#allocation8 + $0x18] sm:$0xff]  ;;  %v990_v22 = vpack.c.bf16 %v112_v17, %v111_v14  ;;  %v201_v23 = vld [vmem:[#allocation8 + $0x20] sm:$0xff]  ;;  %v202_v24 = vld [vmem:[#allocation8 + $0x28] sm:$0xff]  ;;  %v500_v14 = vlaneseq  ;;  %v1239_v15 = vmov 0  }
  0x4f   :  { %v1005_v21 = vpack.c.bf16 %v200_v20, %v199_v19  ;;  %v113_v25 = vld [vmem:[#allocation5 + $0x50] sm:$0xff]  ;;  %v114_v26 = vld [vmem:[#allocation5 + $0x58] sm:$0xff]  ;;  %v1008_v27 = vpack.c.bf16 %v202_v24, %v201_v23  ;;  %v115_v31 = vld [vmem:[#allocation5 + $0x60] sm:$0xff]  ;;  %1102 = vset.pattern.permute.xlu1 %v1239_v15  ;;  %1103 = vset.pattern.permute.xlu0 %v1239_v15 }
  0x50   :  { %1003 = vmatpush3.bf16.msra.mxu1 %v1002_v18  ;;  %v993_v28 = vpack.c.bf16 %v114_v26, %v113_v25  ;;  %v203_v29 = vld [vmem:[#allocation8 + $0x30] sm:$0xff]  ;;  %v204_v30 = vld [vmem:[#allocation8 + $0x38] sm:$0xff]  ;;  %v116_v32 = vld [vmem:[#allocation5 + $0x68] sm:$0xff]  ;;  %v501_v16 = vand.u32 127, %v500_v14 }
  0x51   :  { %982 = vmatpush3.bf16.msra.mxu0 %v981_v7  ;;  %1004 = vmatprep.subr.bf16.mxu1 %v1236_v0  ;;  %v1011_v33 = vpack.c.bf16 %v204_v30, %v203_v29  ;;  %v996_v34 = vpack.c.bf16 %v116_v32, %v115_v31  ;;  %v205_v35 = vld [vmem:[#allocation8 + $0x40] sm:$0xff]  ;;  %v206_v36 = vld [vmem:[#allocation8 + $0x48] sm:$0xff]  ;;  %v117_v37 = vld [vmem:[#allocation5 + $0x70] sm:$0xff] }
  0x52   :  { %983 = vmatprep.subr.bf16.mxu0 %v1236_v0  ;;  %v118_v38 = vld [vmem:[#allocation5 + $0x78] sm:$0xff]  ;;  %v1014_v39 = vpack.c.bf16 %v206_v36, %v205_v35  ;;  %v207_v41 = vld [vmem:[#allocation8 + $0x50] sm:$0xff]  ;;  %v299_v43 = vld [vmem:[#allocation10] sm:$0xff]  ;;  %vm503_vm1 = vcmp.lt.s32.totalorder %v501_v16, 8 }
  0x53   :  { %v999_v40 = vpack.c.bf16 %v118_v38, %v117_v37  ;;  %v208_v42 = vld [vmem:[#allocation8 + $0x58] sm:$0xff]  ;;  %v300_v44 = vld [vmem:[#allocation10 + $0x8] sm:$0xff]  ;;  %v102_v46 = vld [vmem:[%s1498_s0] sm:$0xff]  ;;  %v1427_v17 = vsel %vm503_vm1, 1.0, %v1238_v1 }
  0x54   :  { %1006 = vmatpush3.bf16.msra.mxu1 %v1005_v21  ;;  %v1017_v45 = vpack.c.bf16 %v208_v42, %v207_v41  ;;  %v1026_v47 = vpack.c.bf16 %v300_v44, %v299_v43  ;;  %v209_v48 = vld [vmem:[#allocation8 + $0x60] sm:$0xff]  ;;  %v210_v49 = vld [vmem:[#allocation8 + $0x68] sm:$0xff]  ;;  %v301_v50 = vld [vmem:[#allocation10 + $0x10] sm:$0xff]  ;;  %510 = vperm.xlu1 %1102, %v1427_v17  }
  0x55   :  { %985 = vmatpush3.bf16.msra.mxu0 %v984_v10  ;;  %1007 = vmatprep.subr.bf16.mxu1 %v1236_v0  ;;  %v302_v51 = vld [vmem:[#allocation10 + $0x18] sm:$0xff]  ;;  %v1020_v52 = vpack.c.bf16 %v210_v49, %v209_v48  ;;  %v303_v54 = vld [vmem:[#allocation10 + $0x20] sm:$0xff]  ;;  %v304_v55 = vld [vmem:[#allocation10 + $0x28] sm:$0xff] }
  0x56   :  { %986 = vmatprep.subr.bf16.mxu0 %v1236_v0  ;;  %v1029_v53 = vpack.c.bf16 %v302_v51, %v301_v50  ;;  %v1032_v56 = vpack.c.bf16 %v304_v55, %v303_v54  ;;  %v305_v57 = vld [vmem:[#allocation10 + $0x30] sm:$0xff]  ;;  %v306_v58 = vld [vmem:[#allocation10 + $0x38] sm:$0xff]  ;;  %v307_v60 = vld [vmem:[#allocation10 + $0x40] sm:$0xff] }
  0x57   :  { %v1035_v59 = vpack.c.bf16 %v306_v58, %v305_v57  ;;  %v308_v61 = vld [vmem:[#allocation10 + $0x48] sm:$0xff]  ;;  %v309_v63 = vld [vmem:[#allocation10 + $0x50] sm:$0xff]  ;;  %v310_v2 = vld [vmem:[#allocation10 + $0x58] sm:$0xff] }
  0x58   :  { %1009 = vmatpush3.bf16.msra.mxu1 %v1008_v27  ;;  %v1038_v62 = vpack.c.bf16 %v308_v61, %v307_v60  ;;  %v1041_v3 = vpack.c.bf16 %v310_v2, %v309_v63  ;;  %v311_v4 = vld [vmem:[#allocation10 + $0x60] sm:$0xff]  ;;  %v312_v5 = vld [vmem:[#allocation10 + $0x68] sm:$0xff]  ;;  %v313_v7 = vld [vmem:[#allocation10 + $0x70] sm:$0xff] }
  0x59   :  { %988 = vmatpush3.bf16.msra.mxu0 %v987_v13  ;;  %1010 = vmatprep.subr.bf16.mxu1 %v1236_v0  ;;  %v1044_v6 = vpack.c.bf16 %v312_v5, %v311_v4  ;;  %v314_v8 = vld [vmem:[#allocation10 + $0x78] sm:$0xff]  ;;  %v298_v10 = vld [vmem:[%s1499_s1] sm:$0xff]  ;;  %v211_v11 = vld [vmem:[#allocation8 + $0x70] sm:$0xff] }
  0x5a   :  { %989 = vmatprep.subr.bf16.mxu0 %v1236_v0  ;;  %v1047_v9 = vpack.c.bf16 %v314_v8, %v313_v7  ;;  %v212_v12 = vld [vmem:[#allocation8 + $0x78] sm:$0xff]  ;;  %v594_v18 = vld [vmem:[%s1508_s10] sm:$0xff]  ;;  %v394_v21 = vld [vmem:[#allocation11 + $0x8] sm:$0xff] }
  0x5b   :  { %v1023_v13 = vpack.c.bf16 %v212_v12, %v211_v11  ;;  %597 = vperm.xlu1 %1102, %v594_v18   ;;  %v754_v19 = vld [vmem:[%s1501_s3] ss:$0 sm:$0xff]  ;;  %v395_v27 = vld [vmem:[#allocation11 + $0x10] sm:$0xff]  ;;  %v398_v31 = vld [vmem:[#allocation11 + $0x28] sm:$0xff]  ;;  %s1212_s3 = scalar_lea.hbm %s1511_s13, 16 }
  0x5c   :  { %1012 = vmatpush3.bf16.msra.mxu1 %v1011_v33  ;;  %v393_v20 = vld [vmem:[#allocation11] sm:$0xff]  ;;  %v399_v33 = vld [vmem:[#allocation11 + $0x30] sm:$0xff]  ;;  %v402_v37 = vld [vmem:[#allocation11 + $0x48] sm:$0xff]  ;;  %p1213_p4 = scmp.ne.s32.totalorder %s1511_s13, %s1212_s3  ;;  %p1216_p5 = scmp.lt.u32.totalorder %s1212_s3, %s1511_s13 }
  0x5d   :  { %991 = vmatpush3.bf16.msra.mxu0 %v990_v22  ;;  %1013 = vmatprep.subr.bf16.mxu1 %v1236_v0  ;;  %v1050_v25 = vpack.c.bf16 %v394_v21, %v393_v20  ;;  %v397_v30 = vld [vmem:[#allocation11 + $0x20] sm:$0xff]  ;;  %v406_v43 = vld [vmem:[#allocation11 + $0x68] sm:$0xff] }
  0x5e   :  { %992 = vmatprep.subr.bf16.mxu0 %v1236_v0  ;;  %v1056_v32 = vpack.c.bf16 %v398_v31, %v397_v30  ;;  %v401_v36 = vld [vmem:[#allocation11 + $0x40] sm:$0xff]  ;;  %p1218_p6 = pnand %p1216_p5, %p1213_p4 }
  0x5f   :  { %v1062_v38 = vpack.c.bf16 %v402_v37, %v401_v36  ;;  %v405_v42 = vld [vmem:[#allocation11 + $0x60] sm:$0xff] }
  0x60   :  { %1015 = vmatpush3.bf16.msra.mxu1 %v1014_v39  ;;  %v403_v39 = vld [vmem:[#allocation11 + $0x50] sm:$0xff]  ;;  %v1068_v44 = vpack.c.bf16 %v406_v43, %v405_v42  ;;  %v760_v54 = vld [vmem:[%s1509_s11] ss:$0 sm:$0xff] }
  0x61   :  { %994 = vmatpush3.bf16.msra.mxu0 %v993_v28  ;;  %1016 = vmatprep.subr.bf16.mxu1 %v1236_v0  ;;  %v396_v28 = vld [vmem:[#allocation11 + $0x18] sm:$0xff]  ;;  %v757_v61 = vld [vmem:[%s1507_s9] ss:$0 sm:$0xff] }
  0x62   :  { %995 = vmatprep.subr.bf16.mxu0 %v1236_v0  ;;  %v1053_v29 = vpack.c.bf16 %v396_v28, %v395_v27 }
  0x64   :  { %1018 = vmatpush3.bf16.msra.mxu1 %v1017_v45  ;;  %v407_v45 = vld [vmem:[#allocation11 + $0x70] sm:$0xff] }
  0x65   :  { %997 = vmatpush3.bf16.msra.mxu0 %v996_v34  ;;  %1019 = vmatprep.subr.bf16.mxu1 %v1236_v0  ;;  %v400_v34 = vld [vmem:[#allocation11 + $0x38] sm:$0xff] }
  0x66   :  { %998 = vmatprep.subr.bf16.mxu0 %v1236_v0  ;;  %v1059_v35 = vpack.c.bf16 %v400_v34, %v399_v33 }
  0x68   :  { %1021 = vmatpush3.bf16.msra.mxu1 %v1020_v52 }
  0x69   :  { %1000 = vmatpush3.bf16.msra.mxu0 %v999_v40  ;;  %1022 = vmatprep.subr.bf16.mxu1 %v1236_v0  ;;  %v404_v40 = vld [vmem:[#allocation11 + $0x58] sm:$0xff] }
  0x6a   :  { %1025 = vmatprep.subr.bf16.mxu0 %v1236_v0  ;;  %v1065_v41 = vpack.c.bf16 %v404_v40, %v403_v39 }
  0x6c   :  { %865 = vmatmul.mubr.f32.vlgmr.msra.gmra.mrb[0].mxu0 %v102_v46  ;;  %1024 = vmatpush3.bf16.msra.mxu1 %v1023_v13  ;;  %v408_v46 = vld [vmem:[#allocation11 + $0x78] sm:$0xff] }
  0x6d   :  { %1027 = vmatpush3.bf16.msra.mxu0 %v1026_v47  ;;  %934 = vmatprep.mubr.msk.f32.mxu0 %vm1237_vm0, %v1238_v1  ;;  %v756_v47 = vld [vmem:[%s1505_s7] ss:$0 sm:$0xff]  ;;  %v1071_v48 = vpack.c.bf16 %v408_v46, %v407_v45 }
  0x6e   :  { %1028 = vmatprep.subr.bf16.mxu0 %v1236_v0  ;;  %1049 = vmatprep.subr.bf16.mxu1 %v1236_v0 }
  0x71   :  { %1030 = vmatpush3.bf16.msra.mxu0 %v1029_v53 }
  0x72   :  { %1031 = vmatprep.subr.bf16.mxu0 %v1236_v0 }
  0x75   :  { %1033 = vmatpush3.bf16.msra.mxu0 %v1032_v56 }
  0x76   :  { %1034 = vmatprep.subr.bf16.mxu0 %v1236_v0 }
  0x79   :  { %1036 = vmatpush3.bf16.msra.mxu0 %v1035_v59 }
  0x7a   :  { %1037 = vmatprep.subr.bf16.mxu0 %v1236_v0 }
  0x7d   :  { %1039 = vmatpush3.bf16.msra.mxu0 %v1038_v62 }
  0x7e   :  { %1040 = vmatprep.subr.bf16.mxu0 %v1236_v0 }
  0x81   :  { %1042 = vmatpush3.bf16.msra.mxu0 %v1041_v3 }
  0x82   :  { %1043 = vmatprep.subr.bf16.mxu0 %v1236_v0 }
  0x85   :  { %1045 = vmatpush3.bf16.msra.mxu0 %v1044_v6 }
  0x86   :  { %1046 = vmatprep.subr.bf16.mxu0 %v1236_v0 }
  0x89   :  { %1048 = vmatpush3.bf16.msra.mxu0 %v1047_v9 }
  0x8a   :  { %972 = vmatprep.subr.mxu0 %v1238_v1 }
  0x8c   :  { %935 = vmatmul.mubr.f32.vlgmr.msra.gmra.mrb[2].mxu0 %v298_v10 }
  0x8d   :  { %974 = vmatprep.mubr.msk.f32.mxu0 %vm1237_vm0, %v1238_v1 }
  0xd3   :  { %v511_v53 = vpop.permute.xlu1 %510 }
  0xda   :  { %v598_v55 = vpop.permute.xlu1 %597 }
  0xdb   :  { %vm603_vm2 = vcmp.eq.s32.totalorder %v598_v55, %v760_v54 }
  0xdc   :  { %vm604_vm3 = vmand %vm603_vm2, %vm503_vm1 }
  0xdd   :  { %v1453_v56 = vsel %vm604_vm3, 1.0, %v1238_v1 }
  0xde   :  { %v608_v57 = vsel %vm607_vm4, %v1453_v56, 0.0 }
  0xdf   :  { %609 = vadd.xlane.f32.xlu1 %v608_v57 }
 0x13f   :  { %v192_v22 = vpop.f32.mrb[0].mxu0 }
 0x140   :  { %v193_v23 = vadd.f32 %v754_v19, %v192_v22  ;;  %v866_v24 = vpop.f32.mrb[1].mxu0  ;;  %v759_v19 = vadd.f32 -1.0, %v1427_v17 }
 0x142   :  { %v196_v26 = vmax.f32 %v193_v23, 0.0  ;;  %v523_v20 = vmul.f32 1e+09, %v759_v19 }
 0x144   :  { %900 = vmatmul.mubr.f32.vlgmr.msra.gmra.mrb[0].mxu1 %v196_v26 }
 0x145   :  { %1051 = vmatpush3.bf16.msra.mxu1 %v1050_v25  ;;  %969 = vmatprep.mubr.msk.f32.mxu1 %vm1237_vm0, %v1238_v1  ;;  %v755_v1 = vld [vmem:[%s1503_s5] ss:$0 sm:$0xff] }
 0x146   :  { %1052 = vmatprep.subr.bf16.mxu1 %v1236_v0 }
 0x149   :  { %1054 = vmatpush3.bf16.msra.mxu1 %v1053_v29 }
 0x14a   :  { %1055 = vmatprep.subr.bf16.mxu1 %v1236_v0 }
 0x14d   :  { %1057 = vmatpush3.bf16.msra.mxu1 %v1056_v32 }
 0x14e   :  { %1058 = vmatprep.subr.bf16.mxu1 %v1236_v0 }
 0x151   :  { %1060 = vmatpush3.bf16.msra.mxu1 %v1059_v35 }
 0x152   :  { %1061 = vmatprep.subr.bf16.mxu1 %v1236_v0 }
 0x155   :  { %1063 = vmatpush3.bf16.msra.mxu1 %v1062_v38 }
 0x156   :  { %1064 = vmatprep.subr.bf16.mxu1 %v1236_v0 }
 0x159   :  { %1066 = vmatpush3.bf16.msra.mxu1 %v1065_v41 }
 0x15a   :  { %1067 = vmatprep.subr.bf16.mxu1 %v1236_v0 }
 0x15d   :  { %1069 = vmatpush3.bf16.msra.mxu1 %v1068_v44 }
 0x15e   :  { %1070 = vmatprep.subr.bf16.mxu1 %v1236_v0  ;;  %v517_v0 = vstv %s1510_s12 }
 0x15f   :  { %v388_v49 = vpop.f32.mrb[2].mxu0  ;;  %1104 = vrcp.f32 %v517_v0 }
 0x160   :  { %v389_v50 = vadd.f32 %v756_v47, %v388_v49  ;;  %v936_v51 = vpop.f32.mrb[3].mxu0 }
 0x161   :  { %1072 = vmatpush3.bf16.msra.mxu1 %v1071_v48 }
 0x162   :  { %v392_v52 = vmax.f32 %v389_v50, 0.0 }
 0x164   :  { %970 = vmatmul.mubr.f32.vlgmr.msra.gmra.mrb[2].mxu1 %v392_v52 }
 0x169   :  { %v1105_v58 = vpop.eup %1104 }
 0x16a   :  { %1073 = vpush %v1105_v58 }
 0x16c   :  { %v610_v34 = vpop.xlane.xlu1 %609 }
 0x16d   :  { %v611_v35 = vmax.f32 %v610_v34, 1.0 }
 0x19b   :  { %s1074_s9 = spop %1073 }
 0x19c   :  { %v520_v15 = vstv %s1074_s9 }
 0x217   :  { %v286_v59 = vpop.f32.mrb[0].mxu1 }
 0x218   :  { %v901_v60 = vpop.f32.mrb[1].mxu1  ;;  %v287_v3 = vadd.f32 %v755_v1, %v286_v59 }
 0x21a   :  { %v290_v5 = vmul.f32 %v287_v3, %v287_v3 }
 0x237   :  { %v482_v62 = vpop.f32.mrb[2].mxu1 }
 0x238   :  { %v483_v63 = vadd.f32 %v757_v61, %v482_v62  ;;  %v971_v2 = vpop.f32.mrb[3].mxu1 }
 0x23a   :  { %v486_v4 = vmul.f32 %v483_v63, %v483_v63 }
 0x23c   :  { %487 = vadd.xlane.f32.xlu0 %v486_v4 }
 0x240   :  { %291 = vadd.xlane.f32.xlu0 %v290_v5 }
 0x2c9   :  { %v488_v6 = vpop.xlane.xlu0 %487 }
 0x2ca   :  { %v489_v7 = vmax.f32 %v488_v6, 1e-24 }
 0x2cc   :  { %1106 = vrsqrt.f32 %v489_v7 }
 0x2cd   :  { %v292_v8 = vpop.xlane.xlu0 %291 }
 0x2ce   :  { %v293_v9 = vmax.f32 %v292_v8, 1e-24 }
 0x2d0   :  { %1108 = vrsqrt.f32 %v293_v9 }
 0x2d6   :  { %v1107_v10 = vpop.eup %1106 }
 0x2d7   :  { %v491_v11 = vmul.f32 %v1107_v10, %v483_v63 }
 0x2d9   :  { %v1466_v12 = vmul.f32 %v511_v53, %v491_v11 }
 0x2da   :  { %v1109_v13 = vpop.eup %1108 }
 0x2db   :  { %973 = vmatpush3.xpose.msra.mxu0 %v1466_v12  ;;  %v295_v14 = vmul.f32 %v1109_v13, %v287_v3  ;;  %v710_v10 = vand.u32 2147483647, %v1466_v12  ;;  %v721_v11 = vmul.f32 %v1466_v12, %v1466_v12 }
 0x2dd   :  { %v1469_v16 = vmul.f32 %v511_v53, %v295_v14 }
 0x2df   :  { %v521_v18 = vmul.f32 %v520_v15, %v1469_v16  ;;  %v684_v62 = vand.u32 2147483647, %v1469_v16  ;;  %v695_v9 = vmul.f32 %v1469_v16, %v1469_v16 }
 0x2e1   :  { %975 = vmatmul.mubr.f32.vlgmr.msra.gmra.mrb[4].mxu0 %v521_v18 }
 0x3b4   :  { %v590_v21 = vpop.f32.mrb[4].mxu0 }
 0x3b5   :  { %v591_v22 = vadd.f32 %v590_v21, %v523_v20  ;;  %v976_v23 = vpop.f32.mrb[5].mxu0 }
 0x3b7   :  { %v614_v24 = vsel %vm607_vm4, %v591_v22, -inf }
 0x3b8   :  { %615 = vmax.xlane.f32.xlu0 %v614_v24  ;;  %v626_v25 = vrot.slane %v614_v24, 4 }
 0x3ba   :  { %v627_v26 = vmax.f32 %v614_v24, %v626_v25 }
 0x3bc   :  { %v628_v27 = vrot.slane %v627_v26, 2 }
 0x3be   :  { %v629_v28 = vmax.f32 %v627_v26, %v628_v27 }
 0x3c0   :  { %v630_v29 = vrot.slane %v629_v28, 1 }
 0x3c2   :  { %v631_v30 = vmax.f32 %v629_v28, %v630_v29 }
 0x3c4   :  { %v632_v31 = vsub.f32 %v591_v22, %v631_v30 }
 0x3c6   :  { %v633_v32 = vmul.f32 1.442695, %v632_v31 }
 0x3c8   :  { %1110 = vpow2.f32 %v633_v32 }
 0x3c9   :  { %1112 = vrcp.f32 %v611_v35 }
 0x3d2   :  { %v1111_v33 = vpop.eup %1110 }
 0x3d3   :  { %v635_v36 = vsel %vm607_vm4, %v1111_v33, 0.0  ;;  %v1113_v40 = vpop.eup %1112 }
 0x3d4   :  { %v636_v37 = vrot.slane %v635_v36, 4  ;;  %v613_v42 = vmul.f32 %v1113_v40, %v1453_v56 }
 0x3d6   :  { %v637_v38 = vadd.f32 %v636_v37, %v635_v36  ;;  %v645_v43 = vmul.f32 %v613_v42, %v591_v22 }
 0x3d8   :  { %v638_v39 = vrot.slane %v637_v38, 2  ;;  %v646_v45 = vsel %vm607_vm4, %v645_v43, 0.0 }
 0x3d9   :  { %v650_v47 = vrot.slane %v646_v45, 4 }
 0x3da   :  { %v639_v41 = vadd.f32 %v638_v39, %v637_v38 }
 0x3db   :  { %v651_v48 = vadd.f32 %v650_v47, %v646_v45 }
 0x3dc   :  { %v640_v44 = vrot.slane %v639_v41, 1 }
 0x3dd   :  { %v652_v51 = vrot.slane %v651_v48, 2 }
 0x3de   :  { %v641_v46 = vadd.f32 %v640_v44, %v639_v41 }
 0x3df   :  { %v653_v54 = vadd.f32 %v652_v51, %v651_v48 }
 0x3e0   :  { %1114 = vlog2.f32 %v641_v46 }
 0x3e1   :  { %v654_v0 = vrot.slane %v653_v54, 1 }
 0x3e3   :  { %v655_v58 = vadd.f32 %v654_v0, %v653_v54 }
 0x3ea   :  { %v1115_v53 = vpop.eup %1114 }
 0x3eb   :  { %v643_v55 = vmul.f32 0.6931472, %v1115_v53 }
 0x3ed   :  { %v644_v57 = vadd.f32 %v643_v55, %v631_v30 }
 0x3ef   :  { %v656_v60 = vsub.f32 %v644_v57, %v655_v58 }
 0x3f1   :  { %v669_v61 = vmul.f32 %v1427_v17, %v656_v60 }
 0x3f3   :  { %v671_v1 = vsel %vm670_vm5, %v669_v61, 0.0 }
 0x445   :  { %v616_v49 = vpop.xlane.xlu0 %615 }
 0x446   :  { %v617_v50 = vsub.f32 %v591_v22, %v616_v49 }
 0x448   :  { %v618_v52 = vmul.f32 1.442695, %v617_v50 }
 0x44a   :  { %1116 = vpow2.f32 %v618_v52 }
 0x454   :  { %v1117_v56 = vpop.eup %1116 }
 0x455   :  { %v620_v59 = vsel %vm607_vm4, %v1117_v56, 0.0 }
 0x456   :  { %621 = vadd.xlane.f32.xlu0 %v620_v59 }
 0x45a   :  { %647 = vadd.xlane.f32.xlu0 %v646_v45 }
 0x45e   :  { %672 = vadd.xlane.f32.xlu0 %v671_v1 }
 0x462   :  { %685 = vadd.xlane.f32.xlu0 %v684_v62 }
 0x4e3   :  { %v622_v63 = vpop.xlane.xlu0 %621 }
 0x4e4   :  { %1118 = vlog2.f32 %v622_v63 }
 0x4e7   :  { %v648_v5 = vpop.xlane.xlu0 %647 }
 0x4eb   :  { %v673_v13 = vpop.xlane.xlu0 %672 }
 0x4ec   :  { %v674_v15 = vrot.slane %v673_v13, 4 }
 0x4ee   :  { %v1119_v2 = vpop.eup %1118  ;;  %v675_v19 = vadd.f32 %v674_v15, %v673_v13 }
 0x4ef   :  { %v624_v3 = vmul.f32 0.6931472, %v1119_v2  ;;  %v686_v14 = vpop.xlane.xlu0 %685 }
 0x4f0   :  { %v687_v18 = vrot.slane %v686_v14, 4 }
 0x4f1   :  { %v625_v4 = vadd.f32 %v624_v3, %v616_v49 }
 0x4f2   :  { %v688_v20 = vadd.f32 %v687_v18, %v686_v14 }
 0x4f3   :  { %v649_v6 = vsub.f32 %v625_v4, %v648_v5 }
 0x4f4   :  { %v689_v22 = vrot.slane %v688_v20, 2 }
 0x4f5   :  { %v657_v7 = vmul.f32 %v1427_v17, %v649_v6  ;;  %v676_v17 = vrot.slane %v675_v19, 2 }
 0x4f6   :  { %v690_v28 = vadd.f32 %v689_v22, %v688_v20 }
 0x4f7   :  { %v659_v8 = vsel %vm658_vm6, %v657_v7, 0.0  ;;  %v677_v25 = vadd.f32 %v676_v17, %v675_v19 }
 0x4f8   :  { %660 = vadd.xlane.f32.xlu0 %v659_v8  ;;  %v691_v33 = vrot.slane %v690_v28, 1 }
 0x4f9   :  { %v678_v12 = vrot.slane %v677_v25, 1 }
 0x4fa   :  { %v692_v37 = vadd.f32 %v691_v33, %v690_v28 }
 0x4fb   :  { %v679_v36 = vadd.f32 %v678_v12, %v677_v25 }
 0x4fc   :  { %696 = vadd.xlane.f32.xlu0 %v695_v9 }
 0x500   :  { %711 = vadd.xlane.f32.xlu0 %v710_v10 }
 0x504   :  { %722 = vadd.xlane.f32.xlu0 %v721_v11 }
 0x585   :  { %v661_v21 = vpop.xlane.xlu0 %660 }
 0x586   :  { %v662_v23 = vrot.slane %v661_v21, 4 }
 0x588   :  { %v663_v24 = vadd.f32 %v662_v23, %v661_v21 }
 0x589   :  { %v697_v16 = vpop.xlane.xlu0 %696 }
 0x58a   :  { %v664_v26 = vrot.slane %v663_v24, 2  ;;  %v698_v27 = vrot.slane %v697_v16, 4 }
 0x58c   :  { %v699_v29 = vadd.f32 %v698_v27, %v697_v16  ;;  %v665_v30 = vadd.f32 %v664_v26, %v663_v24 }
 0x58d   :  { %v712_v40 = vpop.xlane.xlu0 %711 }
 0x58e   :  { %v700_v31 = vrot.slane %v699_v29, 2  ;;  %v666_v32 = vrot.slane %v665_v30, 1  ;;  %v713_v42 = vrot.slane %v712_v40, 4 }
 0x590   :  { %v667_v34 = vadd.f32 %v666_v32, %v665_v30  ;;  %v701_v35 = vadd.f32 %v700_v31, %v699_v29  ;;  %v714_v44 = vadd.f32 %v713_v42, %v712_v40 }
 0x591   :  { %v723_v41 = vpop.xlane.xlu0 %722 }
 0x592   :  { %1075 = vpush %v667_v34  ;;  %v702_v38 = vrot.slane %v701_v35, 1  ;;  %v724_v43 = vrot.slane %v723_v41, 4  ;;  %v715_v46 = vrot.slane %v714_v44, 2 }
 0x593   :  { %1077 = vpush %v679_v36 }
 0x594   :  { %1079 = vpush %v692_v37  ;;  %v703_v39 = vadd.f32 %v702_v38, %v701_v35  ;;  %v725_v45 = vadd.f32 %v724_v43, %v723_v41  ;;  %v716_v49 = vadd.f32 %v715_v46, %v714_v44 }
 0x596   :  { %1081 = vpush %v703_v39  ;;  %v726_v47 = vrot.slane %v725_v45, 2  ;;  %v717_v51 = vrot.slane %v716_v49, 1 }
 0x598   :  { %v727_v50 = vadd.f32 %v726_v47, %v725_v45  ;;  %v718_v54 = vadd.f32 %v717_v51, %v716_v49 }
 0x59a   :  { %v728_v52 = vrot.slane %v727_v50, 1 }
 0x59c   :  { %v729_v55 = vadd.f32 %v728_v52, %v727_v50 }
 0x5c3   :  { %s1076_s5 = spop %1075 }
 0x5c4   :  { %s1078_s12 = spop %1077 }
 0x5c5   :  { %s681_s4 = sadd.f32 %s1078_s12, %s1076_s5  ;;  %s1080_s26 = spop %1079 }
 0x5c6   :  { %s694_s23 = smul.f32 0.00390625, %s1080_s26 }
 0x5c7   :  { %s1082_s17 = spop %1081  ;;  %s682_s19 = smul.f32 0.5, %s681_s4 }
 0x5c8   :  { %v705_v48 = vstv %s1082_s17 }
 0x5c9   :  { %1120 = vrsqrt.f32 %v705_v48  ;;  %s683_s24 = smul.f32 0.125, %s682_s19 }
 0x5d3   :  { %v1121_v53 = vpop.eup %1120 }
 0x5d4   :  { %1083 = vpush %v1121_v53 }
 0x5d5   :  { %1085 = vpush %v718_v54 }
 0x5d6   :  { %1087 = vpush %v729_v55 }
 0x605   :  { %s1084_s25 = spop %1083 }
 0x606   :  { %s708_s6 = smul.f32 %s1084_s25, %s694_s23  ;;  %s1086_s18 = spop %1085 }
 0x607   :  { %s1088_s8 = spop %1087  ;;  %s720_s0 = smul.f32 0.00390625, %s1086_s18 }
 0x608   :  { %s709_s20 = sadd.f32 %s708_s6, %s683_s24  ;;  %v731_v0 = vstv %s1088_s8 }
 0x609   :  { %1122 = vrsqrt.f32 %v731_v0 }
 0x613   :  { %v1123_v57 = vpop.eup %1122 }
 0x614   :  { %1089 = vpush %v1123_v57 }
 0x645   :  { %s1090_s21 = spop %1089 }
 0x646   :  { %s734_s1 = smul.f32 %s1090_s21, %s720_s0 }
 0x648   :  { %s735_s22 = sadd.f32 %s734_s1, %s709_s20 }
 0x64a   :  { %737 = sst [smem:[#allocation13]] %s735_s22 }
 0x64b   :  { %1221 = shalt.err (!%p1218_p6)
}
 0x64c   :  { %s1240_s2 = smov [#allocation13]  }
 0x64d   :  { %745 = dma.smem_to_hbm %s1240_s2, 16, %s1511_s13, [#allocation7]  }
 0x64e   :  { %1228 = dma.done.wait [#allocation7], 16  }
 0x64f   :  { %1229 = vsyncadd [#allocation7], 4294967280 }
 0x650   :  { %749 = sfence }
 0x651   :  { %750 = vsyncpa [#allocation6], 1 }
 0x652   :  { %751 = vsyncpa [#allocation9], 1 }
 0x653   :  { %752 = vsyncpa [#allocation12], 1 }
 0x654   :  { %753 = vsyncpa [#allocation7], 1 }

</bundles_post_ra>
